<compile_context>
chip_gen: v7x
topology: tpu7x:2x2x1
jax: 0.10.0
libtpu: 0.0.40
codegen_flags: <defaults>
</compile_context>

<pallas_src>
import functools

import jax
import jax.numpy as jnp
from jax.experimental import pallas as pl
from jax.experimental.pallas import tpu as pltpu


def _attention_kernel(x_ref, mask_ref, wt_ref, b_ref, ctx_ref,
                      out_ref, attn_ref, *, valid_s, compute_dtype):
    # x_ref:    (TB, S, E)   inputs for TB batch rows (S, E padded)
    # mask_ref: (TB, S)      mask (exactly 1 = keep, 0 = padding), f32
    # wt_ref:   (E, E)       W^T  (hidden = x @ W^T)
    # b_ref:    (1, E)       bias
    # ctx_ref:  (1, E)       context vector
    # out_ref:  (TB, E)      pooled outputs (f32)
    # attn_ref: (TB, S)      attention weights (f32, lane-dense when S%128==0)
    TB, S, E = x_ref.shape
    f32 = jnp.float32

    x = x_ref[...]                                       # (TB, S, E)
    x2 = x.reshape(TB * S, E)                            # layout-preserving: S%8==0, E%128==0

    # Linear: one large (TB*S, E) @ (E, E) MXU matmul per grid step, f32 acc.
    lin = jnp.dot(x2, wt_ref[...], preferred_element_type=f32)
    lin = lin + b_ref[...].astype(f32)
    # tanh on the EUP; in bf16 mode it runs at half width (bf16 EUP on v6e/v7x).
    hidden = jnp.tanh(lin.astype(compute_dtype)).astype(f32)      # (TB*S, E)

    # importance = <hidden, context> per (batch, position) -> (TB, S), S on lanes.
    ctx = ctx_ref[...].astype(f32)                       # (1, E)
    imp = jnp.sum(hidden.reshape(TB, S, E) * ctx, axis=-1)

    # masked fill (PyTorch: masked_fill(mask == 0, -1e9)).
    # NOTE: mask is assumed to be exactly 0/1, as in the PyTorch module.
    imp = jnp.where(mask_ref[...] == 0, jnp.float32(-1e9), imp)
    if valid_s < S:
        # Padded sequence columns get -inf so they carry exactly zero weight
        # even in the degenerate all-masked-row case.
        col = jax.lax.broadcasted_iota(jnp.int32, (TB, S), 1)
        imp = jnp.where(col >= valid_s, -jnp.inf, imp)

    # softmax over the sequence (lane) axis; exact divide for parity with torch.
    m = jnp.max(imp, axis=-1, keepdims=True)             # (TB, 1)
    e = jnp.exp(imp - m)                                  # (TB, S)
    weights = e / jnp.sum(e, axis=-1, keepdims=True)      # (TB, S) f32

    # Weighted pooling over S on the VPU + XLU (sublane reduce).  The batched
    # M=1 MXU einsum wastes MXU rows and serializes result pops on v5e/v6e.
    out_ref[...] = jnp.sum(x * weights[:, :, None], axis=1).astype(out_ref.dtype)
    attn_ref[...] = weights


def _round_up(x, m):
    return -(-x // m) * m


def _choose_block_b(B, S_pad, E_pad, itemsize, x_block_cap):
    """Pick the per-grid-step batch tile."""
    # Aim for >= ~256 sublane rows per step so the Linear matmul fills the MXU
    # and the ~0.35us (~600 cycle) per-grid-step overhead is amortized.
    tb = pl.cdiv(256, S_pad)
    if tb >= B:
        block_b = B
    else:
        block_b = max(8, (tb // 8) * 8)          # sublane-align the 2-D blocks
    # Cap the x block so double-buffering comfortably fits the explicit VMEM
    # budget on every generation (incl. v7x's 64 MiB physical VMEM).
    while block_b > 8 and block_b * S_pad * E_pad * itemsize > x_block_cap:
        block_b = max(8, ((block_b // 2) // 8) * 8)
    return min(block_b, B)


def attention_forward(inputs, mask, w, b, context, *, block_b=None,
                      use_bf16_matmul=False):
    """inputs: [B,S,E] f32, mask: [B,S] (0/1), w: [E,E], b: [E], context: [E].

    Set use_bf16_matmul=True on v6e/v7x: bf16 MXU inputs (f32 accumulation),
    bf16 tanh, and half the HBM DMA bytes for x and W^T.
    """
    B, S, E = inputs.shape
    f32 = jnp.float32
    matmul_dtype = jnp.bfloat16 if use_bf16_matmul else f32
    itemsize = jnp.dtype(matmul_dtype).itemsize

    # --- padding policy -----------------------------------------------------
    E_pad = _round_up(E, 128)                    # full 128-lane occupancy
    # S: multiple of 8 always (layout-preserving reshape); multiple of 128
    # (lane-dense attn/mask stores) only when the extra linear FLOPs (which
    # scale with S_pad) stay below ~25%.
    s8, s128 = _round_up(S, 8), _round_up(S, 128)
    S_pad = s128 if s128 * 4 <= s8 * 5 else s8

    if block_b is None:
        block_b = _choose_block_b(B, S_pad, E_pad, itemsize,
                                  x_block_cap=(8 << 20))
    B_pad = _round_up(B, block_b)
    grid_b = B_pad // block_b

    # --- wrapper-side padding + dtype casts (bf16 cast happens HERE) --------
    x_p = jnp.pad(inputs.astype(matmul_dtype),
                  ((0, B_pad - B), (0, S_pad - S), (0, E_pad - E)))
    mask_p = jnp.pad(mask.astype(f32), ((0, B_pad - B), (0, S_pad - S)))
    wt_p = jnp.pad(w.astype(f32).T,
                   ((0, E_pad - E), (0, E_pad - E))).astype(matmul_dtype)
    b_p = jnp.pad(b.astype(f32),
                  (0, E_pad - E)).reshape(1, E_pad).astype(matmul_dtype)
    ctx_p = jnp.pad(context.astype(f32),
                    (0, E_pad - E)).reshape(1, E_pad).astype(matmul_dtype)

    # --- explicit VMEM budget (double-buffered blocks) ----------------------
    x_blk = block_b * S_pad * E_pad * itemsize
    w_blk = E_pad * E_pad * itemsize
    small_blk = 2 * E_pad * itemsize
    mask_blk = block_b * S_pad * 4
    out_blk = block_b * E_pad * 4
    attn_blk = block_b * S_pad * 4
    vmem_need = 2 * (x_blk + w_blk + small_blk + mask_blk + out_blk + attn_blk)
    if vmem_need > (56 << 20):
        raise ValueError(
            f"attention_forward: blocks need ~{vmem_need >> 20} MiB VMEM, "
            "which cannot fit v7x (64 MiB).  "
            "# TODO(synk): add S-tiling (online softmax) / K-tiling over E.")
    vmem_limit = min(64 << 20, max(32 << 20, vmem_need + (4 << 20)))

    kernel = functools.partial(_attention_kernel, valid_s=S,
                               compute_dtype=matmul_dtype)

    # Advisory cost estimate so XLA can schedule/overlap this small kernel.
    flops = (2 * B_pad * S_pad * E_pad * E_pad       # linear
             + 2 * B_pad * S_pad * E_pad             # context score
             + 2 * B_pad * S_pad * E_pad)            # pooling
    transcendentals = B_pad * S_pad * E_pad + B_pad * S_pad   # tanh + exp
    bytes_accessed = (x_p.size * itemsize + wt_p.size * itemsize
                      + b_p.size * itemsize + ctx_p.size * itemsize
                      + mask_p.size * 4 + B_pad * E_pad * 4 + B_pad * S_pad * 4)

    out, attn = pl.pallas_call(
        kernel,
        out_shape=(
            jax.ShapeDtypeStruct((B_pad, E_pad), f32),
            jax.ShapeDtypeStruct((B_pad, S_pad), f32),
        ),
        grid_spec=pltpu.PrefetchScalarGridSpec(
            num_scalar_prefetch=0,
            grid=(grid_b,),
            in_specs=[
                pl.BlockSpec((block_b, S_pad, E_pad), lambda i: (i, 0, 0)),  # x
                pl.BlockSpec((block_b, S_pad), lambda i: (i, 0)),            # mask
                pl.BlockSpec((E_pad, E_pad), lambda i: (0, 0)),              # W^T
                pl.BlockSpec((1, E_pad), lambda i: (0, 0)),                  # bias
                pl.BlockSpec((1, E_pad), lambda i: (0, 0)),                  # ctx
            ],
            out_specs=[
                pl.BlockSpec((block_b, E_pad), lambda i: (i, 0)),            # out
                pl.BlockSpec((block_b, S_pad), lambda i: (i, 0)),            # attn
            ],
        ),
        compiler_params=pltpu.CompilerParams(
            dimension_semantics=("parallel",),
            vmem_limit_bytes=vmem_limit),
        cost_estimate=pl.CostEstimate(flops=flops,
                                      transcendentals=transcendentals,
                                      bytes_accessed=bytes_accessed),
    )(x_p, mask_p, wt_p, b_p, ctx_p)

    return out[:B, :E], attn[:B, :S]


def _reference(inputs, mask, w, b, context):
    hidden = jnp.tanh(jnp.einsum("bse,fe->bsf", inputs, w) + b)
    imp = jnp.sum(hidden * context, axis=-1)
    imp = jnp.where(mask == 0, -1e9, imp)
    attn = jax.nn.softmax(imp, axis=-1)
    out = jnp.sum(inputs * attn[..., None], axis=-2)
    return out, attn


def _make_example(key, B, S, E):
    k1, k2, k3, k4 = jax.random.split(key, 4)
    inputs = jax.random.normal(k1, (B, S, E), dtype=jnp.float32)
    # mask: 1 for valid tokens, 0 for padding (pad out the tail of the last seq)
    mask = jnp.ones((B, S), dtype=jnp.float32)
    mask = mask.at[B - 1, (2 * S) // 3:].set(0.0)
    # Deterministic parameter init (shapes from the PyTorch __init__):
    #   context: [E] ~ normal, linear_hidden: Linear(E, E) -> W [E, E], b [E]
    context = jax.random.normal(k2, (E,), dtype=jnp.float32)
    bound = 1.0 / jnp.sqrt(E)
    w = jax.random.uniform(k3, (E, E), minval=-bound, maxval=bound,
                           dtype=jnp.float32)
    b = jax.random.uniform(k4, (E,), minval=-bound, maxval=bound,
                           dtype=jnp.float32)
    return inputs, mask, w, b, context


if __name__ == "__main__":
    # Primary small-shape test (f32 path, tight tolerance).
    B, S, E = 2, 8, 32
    inputs, mask, w, b, context = _make_example(jax.random.PRNGKey(0), B, S, E)

    out, attn = attention_forward(inputs, mask, w, b, context)
    jax.block_until_ready((out, attn))

    out_ref, attn_ref = _reference(inputs, mask, w, b, context)
    assert out.shape == (B, E) and attn.shape == (B, S)
    assert jnp.allclose(out, out_ref, atol=2e-3, rtol=2e-3)
    assert jnp.allclose(attn, attn_ref, atol=2e-3, rtol=2e-3)
    # Exact-divide softmax: rows of attention weights sum to 1.
    assert jnp.allclose(jnp.sum(attn, axis=-1), 1.0, atol=1e-5)

    # bf16-matmul path (the recommended setting on v6e / v7x), looser tolerance.
    out_bf, attn_bf = attention_forward(inputs, mask, w, b, context,
                                        use_bf16_matmul=True)
    jax.block_until_ready((out_bf, attn_bf))
    assert jnp.allclose(out_bf, out_ref, atol=5e-2, rtol=5e-2)
    assert jnp.allclose(attn_bf, attn_ref, atol=5e-2, rtol=5e-2)

    # Ragged shape: exercises S padding (5 -> 8), E padding (20 -> 128) and
    # exact zeroing of padded sequence columns.
    B2, S2, E2 = 3, 5, 20
    inputs2, mask2, w2, b2, context2 = _make_example(jax.random.PRNGKey(1),
                                                     B2, S2, E2)
    out2, attn2 = attention_forward(inputs2, mask2, w2, b2, context2)
    jax.block_until_ready((out2, attn2))
    out2_ref, attn2_ref = _reference(inputs2, mask2, w2, b2, context2)
    assert out2.shape == (B2, E2) and attn2.shape == (B2, S2)
    assert jnp.allclose(out2, out2_ref, atol=2e-3, rtol=2e-3)
    assert jnp.allclose(attn2, attn2_ref, atol=2e-3, rtol=2e-3)

    print("KERNEL_OK")
</pallas_src>

<mosaic_0001>
module attributes {stable_mosaic.version = 11 : i64} {
  func.func @_attention_kernel(%arg0: i32, %arg1: memref<2x8x128xf32, #tpu.memory_space<vmem>>, %arg2: memref<2x8xf32, #tpu.memory_space<vmem>>, %arg3: memref<128x128xf32, #tpu.memory_space<vmem>>, %arg4: memref<1x128xf32, #tpu.memory_space<vmem>>, %arg5: memref<1x128xf32, #tpu.memory_space<vmem>>, %arg6: memref<2x128xf32, #tpu.memory_space<vmem>>, %arg7: memref<2x8xf32, #tpu.memory_space<vmem>>) attributes {dimension_semantics = [#tpu.dimension_semantics<parallel>], iteration_bounds = array<i64: 1>, scalar_prefetch = 0 : i64, scratch_operands = 0 : i64, tpu.core_type = #tpu.core_type<tc>, window_params = [{transform_indices = @transform_0, window_bounds = array<i64: 2, 8, 128>}, {transform_indices = @transform_1, window_bounds = array<i64: 2, 8>}, {pipeline_mode = #tpu.pipeline_mode<synchronous>, transform_indices = @transform_2, window_bounds = array<i64: 128, 128>}, {pipeline_mode = #tpu.pipeline_mode<synchronous>, transform_indices = @transform_3, window_bounds = array<i64: 1, 128>}, {pipeline_mode = #tpu.pipeline_mode<synchronous>, transform_indices = @transform_4, window_bounds = array<i64: 1, 128>}, {transform_indices = @transform_5, window_bounds = array<i64: 2, 128>}, {transform_indices = @transform_6, window_bounds = array<i64: 2, 8>}]} {
    %c0 = arith.constant 0 : index
    %c0_0 = arith.constant 0 : index
    %c0_1 = arith.constant 0 : index
    %0 = vector.load %arg1[%c0, %c0_0, %c0_1] : memref<2x8x128xf32, #tpu.memory_space<vmem>>, vector<2x8x128xf32>
    %1 = vector.shape_cast %0 : vector<2x8x128xf32> to vector<16x128xf32>
    %c0_2 = arith.constant 0 : index
    %c0_3 = arith.constant 0 : index
    %2 = vector.load %arg3[%c0_2, %c0_3] : memref<128x128xf32, #tpu.memory_space<vmem>>, vector<128x128xf32>
    %cst = arith.constant dense<0.000000e+00> : vector<16x128xf32>
    %3 = tpu.matmul %1, %2, %cst {dimension_numbers = #tpu.dot_dimension_numbers<[1], [0], [0], [1], [0, 0, 1, 1], [], []>} : vector<16x128xf32>, vector<128x128xf32>, vector<16x128xf32> -> vector<16x128xf32>
    %c0_4 = arith.constant 0 : index
    %c0_5 = arith.constant 0 : index
    %4 = vector.load %arg4[%c0_4, %c0_5] : memref<1x128xf32, #tpu.memory_space<vmem>>, vector<1x128xf32>
    %5 = vector.broadcast %4 : vector<1x128xf32> to vector<16x128xf32>
    %6 = arith.addf %3, %5 : vector<16x128xf32>
    %7 = math.tanh %6 : vector<16x128xf32>
    %c0_6 = arith.constant 0 : index
    %c0_7 = arith.constant 0 : index
    %8 = vector.load %arg5[%c0_6, %c0_7] : memref<1x128xf32, #tpu.memory_space<vmem>>, vector<1x128xf32>
    %9 = vector.shape_cast %7 : vector<16x128xf32> to vector<2x8x128xf32>
    %10 = vector.shape_cast %8 : vector<1x128xf32> to vector<1x1x128xf32>
    %11 = vector.broadcast %10 : vector<1x1x128xf32> to vector<2x8x128xf32>
    %12 = arith.mulf %9, %11 : vector<2x8x128xf32>
    %cst_8 = arith.constant dense<0.000000e+00> : vector<2x8xf32>
    %13 = vector.multi_reduction <add>, %12, %cst_8 [2] : vector<2x8x128xf32> to vector<2x8xf32>
    %c0_9 = arith.constant 0 : index
    %c0_10 = arith.constant 0 : index
    %14 = vector.load %arg2[%c0_9, %c0_10] : memref<2x8xf32, #tpu.memory_space<vmem>>, vector<2x8xf32>
    %cst_11 = arith.constant 0.000000e+00 : f32
    %15 = vector.broadcast %cst_11 : f32 to vector<2x8xf32>
    %16 = arith.cmpf oeq, %14, %15 : vector<2x8xf32>
    %cst_12 = arith.constant -1.000000e+09 : f32
    %17 = vector.broadcast %cst_12 : f32 to vector<2x8xf32>
    %18 = arith.select %16, %17, %13 : vector<2x8xi1>, vector<2x8xf32>
    %cst_13 = arith.constant dense<0xFF800000> : vector<2xf32>
    %19 = vector.multi_reduction <maximumf>, %18, %cst_13 [1] : vector<2x8xf32> to vector<2xf32>
    %20 = vector.shape_cast %19 : vector<2xf32> to vector<2x1xf32>
    %21 = vector.broadcast %20 : vector<2x1xf32> to vector<2x8xf32>
    %22 = arith.subf %18, %21 : vector<2x8xf32>
    %23 = math.exp %22 : vector<2x8xf32>
    %cst_14 = arith.constant dense<0.000000e+00> : vector<2xf32>
    %24 = vector.multi_reduction <add>, %23, %cst_14 [1] : vector<2x8xf32> to vector<2xf32>
    %25 = vector.shape_cast %24 : vector<2xf32> to vector<2x1xf32>
    %26 = vector.broadcast %25 : vector<2x1xf32> to vector<2x8xf32>
    %27 = arith.divf %23, %26 : vector<2x8xf32>
    %28 = vector.shape_cast %27 : vector<2x8xf32> to vector<2x8x1xf32>
    %29 = vector.broadcast %28 : vector<2x8x1xf32> to vector<2x8x128xf32>
    %30 = arith.mulf %0, %29 : vector<2x8x128xf32>
    %cst_15 = arith.constant dense<0.000000e+00> : vector<2x128xf32>
    %31 = vector.multi_reduction <add>, %30, %cst_15 [1] : vector<2x8x128xf32> to vector<2x128xf32>
    %c0_16 = arith.constant 0 : index
    %c0_17 = arith.constant 0 : index
    %32 = vector.load %arg6[%c0_16, %c0_17] : memref<2x128xf32, #tpu.memory_space<vmem>>, vector<2x128xf32>
    tpu.vector_store %arg6[%c0_16, %c0_17], %31 {strides = array<i32>} : memref<2x128xf32, #tpu.memory_space<vmem>>, vector<2x128xf32>,
    %c0_18 = arith.constant 0 : index
    %c0_19 = arith.constant 0 : index
    %33 = vector.load %arg7[%c0_18, %c0_19] : memref<2x8xf32, #tpu.memory_space<vmem>>, vector<2x8xf32>
    tpu.vector_store %arg7[%c0_18, %c0_19], %27 {strides = array<i32>} : memref<2x8xf32, #tpu.memory_space<vmem>>, vector<2x8xf32>,
    return
  }
  func.func @transform_0(%arg0: i32) -> (i32, i32, i32) {
    %c0_i32 = arith.constant 0 : i32
    %c0_i32_0 = arith.constant 0 : i32
    %c0_i32_1 = arith.constant 0 : i32
    return %arg0, %c0_i32, %c0_i32_0 : i32, i32, i32
  }
  func.func @transform_1(%arg0: i32) -> (i32, i32) {
    %c0_i32 = arith.constant 0 : i32
    %c0_i32_0 = arith.constant 0 : i32
    return %arg0, %c0_i32 : i32, i32
  }
  func.func @transform_2(%arg0: i32) -> (i32, i32) {
    %c0_i32 = arith.constant 0 : i32
    %c0_i32_0 = arith.constant 0 : i32
    %c0_i32_1 = arith.constant 0 : i32
    return %c0_i32, %c0_i32_0 : i32, i32
  }
  func.func @transform_3(%arg0: i32) -> (i32, i32) {
    %c0_i32 = arith.constant 0 : i32
    %c0_i32_0 = arith.constant 0 : i32
    %c0_i32_1 = arith.constant 0 : i32
    return %c0_i32, %c0_i32_0 : i32, i32
  }
  func.func @transform_4(%arg0: i32) -> (i32, i32) {
    %c0_i32 = arith.constant 0 : i32
    %c0_i32_0 = arith.constant 0 : i32
    %c0_i32_1 = arith.constant 0 : i32
    return %c0_i32, %c0_i32_0 : i32, i32
  }
  func.func @transform_5(%arg0: i32) -> (i32, i32) {
    %c0_i32 = arith.constant 0 : i32
    %c0_i32_0 = arith.constant 0 : i32
    return %arg0, %c0_i32 : i32, i32
  }
  func.func @transform_6(%arg0: i32) -> (i32, i32) {
    %c0_i32 = arith.constant 0 : i32
    %c0_i32_0 = arith.constant 0 : i32
    return %arg0, %c0_i32 : i32, i32
  }
}

</mosaic_0001>

<bundles_post_ra>
// kernel: tpu_custom_call.1
= control target key start
LH: loop header
LB: loop body
LE: loop exit
PB: predicated region body
PF: predicated region fallthrough
CT: control target
= control target key end

     0   :  { %12 = vsyncpa [#allocation3], 0  ;;  %s569_s0 = inlined_call_operand.hbm [shape: f32[2,8,128], index: 0, kind: input, shape index: {}]   ;;  %s570_s1 = inlined_call_operand.vmem [shape: f32[2,8], index: 1, kind: input, shape index: {}]   ;;  %s571_s2 = inlined_call_operand.hbm [shape: f32[128,128], index: 2, kind: input, shape index: {}]   ;;  %s572_s3 = inlined_call_operand.vmem [shape: f32[1,128], index: 3, kind: input, shape index: {}]   ;;  %s573_s4 = inlined_call_operand.vmem [shape: f32[1,128], index: 4, kind: input, shape index: {}]   ;;  %s574_s5 = inlined_call_operand.hbm [shape: f32[2,128], index: 5, kind: output, shape index: {0}]   ;;  %s575_s6 = inlined_call_operand.hbm [shape: f32[2,8], index: 6, kind: output, shape index: {1}]  }
   0x1   :  { %13 = vsyncpa [#allocation6], 0 }
   0x2   :  { %14 = vsyncpa [#allocation4], 0 }
   0x3   :  { %15 = vsyncpa [#allocation9], 0  ;;  %s458_s21 = smov [#allocation2]   ;;  %s362_s25 = scalar_lea.hbm %s569_s0, 256 }
   0x4   :  { %s21_s22 = sshll.u32 %s458_s21, 4  ;;  %p363_p0 = scmp.ne.s32.totalorder %s569_s0, %s362_s25  ;;  %s22_s22 = int_to_ptr.vmem [resolvable:$true] %s21_s22 }
   0x5   :  { %p366_p1 = scmp.lt.u32.totalorder %s362_s25, %s569_s0 }
   0x7   :  { %p368_p2 = pnand %p366_p1, %p363_p0 }
   0x9   :  { %371 = shalt.err (!%p368_p2)
}
   0xa   :  { %s372_s30 = scalar_lea.vmem %s22_s22, 256  ;;  %p377_p4 = scmp.lt.s32.totalorder %s22_s22, %s22_s22 }
   0xb   :  { %p373_p3 = scmp.ne.s32.totalorder %s22_s22, %s372_s30  ;;  %p378_p5 = scmp.lt.s32.totalorder %s372_s30, %s372_s30 }
   0xd   :  { %p379_p6 = por %p378_p5, %p377_p4 }
   0xf   :  { %p380_p7 = pnand %p379_p6, %p373_p3 }
  0x11   :  { %383 = shalt.err (!%p380_p7)
}
  0x12   :  { %s459_s7 = smov 128   ;;  %s460_s8 = smov 8  }
  0x13   :  { %27 = dma.hbm_to_vmem [thread:$0]  %s569_s0, 256, %s22_s22, [#allocation3], %s459_s7, %s459_s7, %s460_s8  }
  0x14   :  { %s461_s11 = smov [#allocation5]   ;;  %s384_s15 = scalar_lea.hbm %s571_s2, 2048 }
  0x15   :  { %s35_s12 = sshll.u32 %s461_s11, 4  ;;  %p385_p8 = scmp.ne.s32.totalorder %s571_s2, %s384_s15  ;;  %s36_s12 = int_to_ptr.vmem [resolvable:$true] %s35_s12 }
  0x16   :  { %p388_p9 = scmp.lt.u32.totalorder %s384_s15, %s571_s2 }
  0x18   :  { %p390_p10 = pnand %p388_p9, %p385_p8 }
  0x1a   :  { %393 = shalt.err (!%p390_p10)
}
  0x1b   :  { %s394_s20 = scalar_lea.vmem %s36_s12, 2048  ;;  %p399_p12 = scmp.lt.s32.totalorder %s36_s12, %s36_s12 }
  0x1c   :  { %p395_p11 = scmp.ne.s32.totalorder %s36_s12, %s394_s20  ;;  %p400_p13 = scmp.lt.s32.totalorder %s394_s20, %s394_s20 }
  0x1e   :  { %p401_p0 = por %p400_p13, %p399_p12 }
  0x20   :  { %p402_p1 = pnand %p401_p0, %p395_p11 }
  0x22   :  { %405 = shalt.err (!%p402_p1)
}
  0x23   :  { %41 = dma.hbm_to_vmem [thread:$0]  %s571_s2, 2048, %s36_s12, [#allocation6], %s459_s7, %s459_s7, %s460_s8  }
  0x24   :  { %450 = dma.done.wait [#allocation3], 256  }
  0x25   :  { %451 = vsyncadd [#allocation3], 4294967040 }
  0x26   :  { %452 = dma.done.wait [#allocation6], 2048  }
  0x27   :  { %453 = vsyncadd [#allocation6], 4294965248  ;;  %v54_v0 = vld [vmem:[#allocation5] sm:$0xff]  ;;  %v55_v1 = vld [vmem:[#allocation5 + $0x8] sm:$0xff]  ;;  %v171_v36 = vlaneseq  ;;  %vm181_vm0 = vcmask 1041409   ;;  %vm185_vm2 = vcmask 58368  }
  0x28   :  { %v56_v2 = vld [vmem:[#allocation5 + $0x10] sm:$0xff]  ;;  %v316_v3 = vpack.c.bf16 %v55_v1, %v54_v0  ;;  %v57_v4 = vld [vmem:[#allocation5 + $0x18] sm:$0xff]  ;;  %v58_v6 = vld [vmem:[#allocation5 + $0x20] sm:$0xff] }
  0x29   :  { %v320_v5 = vpack.c.bf16 %v57_v4, %v56_v2  ;;  %v59_v7 = vld [vmem:[#allocation5 + $0x28] sm:$0xff]  ;;  %v523_v9 = vld [vmem:[#allocation2] sm:$0xff]  ;;  %v61_v11 = vld [vmem:[#allocation5 + $0x38] sm:$0xff]  ;;  %v172_v37 = vand.u32 127, %v171_v36  ;;  %v174_v38 = vshrl.u32 %v171_v36, 7 }
  0x2a   :  { %317 = vmatprep.subr.bf16.mxu0 %v316_v3  ;;  %v324_v8 = vpack.c.bf16 %v59_v7, %v58_v6  ;;  %v60_v10 = vld [vmem:[#allocation5 + $0x30] sm:$0xff]  ;;  %313 = vmatprep.mubr.f32.mxu0 %v523_v9  ;;  %v62_v13 = vld [vmem:[#allocation5 + $0x40] sm:$0xff]  ;;  %v63_v14 = vld [vmem:[#allocation5 + $0x48] sm:$0xff] }
  0x2b   :  { %319 = vmatpush3.bf16.msra.mxu0 %v316_v3  ;;  %v328_v12 = vpack.c.bf16 %v61_v11, %v60_v10  ;;  %v332_v15 = vpack.c.bf16 %v63_v14, %v62_v13  ;;  %v64_v16 = vld [vmem:[#allocation5 + $0x50] sm:$0xff]  ;;  %v65_v17 = vld [vmem:[#allocation5 + $0x58] sm:$0xff]  ;;  %v66_v19 = vld [vmem:[#allocation5 + $0x60] sm:$0xff]  ;;  %v175_v40 = vsub.s32 %v172_v37, %v174_v38  ;;  %v206_v54 = vsub.s32 1, %v174_v38 }
  0x2c   :  { %321 = vmatprep.subr.bf16.mxu0 %v320_v5  ;;  %v336_v18 = vpack.c.bf16 %v65_v17, %v64_v16  ;;  %v67_v20 = vld [vmem:[#allocation5 + $0x68] sm:$0xff]  ;;  %v68_v22 = vld [vmem:[#allocation5 + $0x70] sm:$0xff]  ;;  %v69_v23 = vld [vmem:[#allocation5 + $0x78] sm:$0xff]  ;;  %v199_v55 = vsub.s32 0, %v174_v38 }
  0x2d   :  { %v340_v21 = vpack.c.bf16 %v67_v20, %v66_v19  ;;  %v344_v24 = vpack.c.bf16 %v69_v23, %v68_v22  ;;  %v526_v25 = vld [vmem:[#allocation2 + $0x8] sm:$0xff]  ;;  %v261_v26 = vld [vmem:[%s572_s3] ss:$0 sm:$0xff] }
  0x2e   :  { %v262_v31 = vld [vmem:[%s573_s4] ss:$0 sm:$0xff] }
  0x2f   :  { %323 = vmatpush3.bf16.msra.mxu0 %v320_v5  ;;  %v167_v41 = vld [vmem:[%s570_s1] sm:$0x3]  ;;  %s462_s1 = smov [#allocation8]  }
  0x30   :  { %325 = vmatprep.subr.bf16.mxu0 %v324_v8  ;;  %vm168_vm1 = vcmp.eq.f32.partialorder %v167_v41, 0.0  ;;  %s247_s4 = sshll.u32 %s462_s1, 4  ;;  %s248_s4 = int_to_ptr.vmem [resolvable:$true] %s247_s4 }
  0x31   :  { %s406_s26 = scalar_lea.vmem %s248_s4, 32  ;;  %p411_p3 = scmp.lt.s32.totalorder %s248_s4, %s248_s4 }
  0x32   :  { %p407_p2 = scmp.ne.s32.totalorder %s248_s4, %s406_s26  ;;  %p412_p4 = scmp.lt.s32.totalorder %s406_s26, %s406_s26 }
  0x33   :  { %327 = vmatpush3.bf16.msra.mxu0 %v324_v8 }
  0x34   :  { %329 = vmatprep.subr.bf16.mxu0 %v328_v12  ;;  %p413_p5 = por %p412_p4, %p411_p3 }
  0x36   :  { %p414_p6 = pnand %p413_p5, %p407_p2 }
  0x37   :  { %331 = vmatpush3.bf16.msra.mxu0 %v328_v12 }
  0x38   :  { %333 = vmatprep.subr.bf16.mxu0 %v332_v15 }
  0x3b   :  { %335 = vmatpush3.bf16.msra.mxu0 %v332_v15 }
  0x3c   :  { %337 = vmatprep.subr.bf16.mxu0 %v336_v18 }
  0x3f   :  { %339 = vmatpush3.bf16.msra.mxu0 %v336_v18 }
  0x40   :  { %341 = vmatprep.subr.bf16.mxu0 %v340_v21 }
  0x43   :  { %343 = vmatpush3.bf16.msra.mxu0 %v340_v21 }
  0x44   :  { %345 = vmatprep.subr.bf16.mxu0 %v344_v24 }
  0x47   :  { %347 = vmatpush3.bf16.msra.mxu0 %v344_v24 }
  0x4a   :  { %314 = vmatmul.mubr.f32.vlgmr.msra.gmra.mrb[0].mxu0 %v526_v25 }
 0x11d   :  { %v315_v27 = vpop.f32.mrb[0].mxu0 }
 0x11e   :  { %v143_v28 = vpop.f32.mrb[1].mxu0  ;;  %v149_v29 = vadd.f32 %v315_v27, %v261_v26 }
 0x11f   :  { %v144_v30 = vadd.f32 %v261_v26, %v143_v28 }
 0x121   :  { %354 = vtanh.f32 %v144_v30 }
 0x122   :  { %356 = vtanh.f32 %v149_v29 }
 0x12b   :  { %v355_v32 = vpop.eup %354 }
 0x12c   :  { %v161_v33 = vmul.f32 %v355_v32, %v262_v31  ;;  %v357_v34 = vpop.eup %356 }
 0x12d   :  { %v162_v35 = vmul.f32 %v357_v34, %v262_v31 }
 0x12e   :  { %163 = vadd.xlane.f32.xlu0 %v161_v33 }
 0x132   :  { %165 = vadd.xlane.f32.xlu0 %v162_v35 }
 0x1bb   :  { %v164_v39 = vpop.xlane.xlu0 %163 }
 0x1bc   :  { %v176_v43 = vrot.slane %v164_v39, %v175_v40 }
 0x1bf   :  { %v166_v42 = vpop.xlane.xlu0 %165 }
 0x1c0   :  { %v180_v44 = vrot.slane %v166_v42, %v175_v40 }
 0x1c2   :  { %v182_v45 = vsel %vm181_vm0, %v180_v44, %v176_v43 }
 0x1c3   :  { %v184_v46 = vsel %vm168_vm1, -1e+09, %v182_v45 }
 0x1c4   :  { %v186_v47 = vsel %vm185_vm2, %v184_v46, -inf }
 0x1c5   :  { %187 = vmax.xlane.f32.xlu1 %v186_v47 }
 0x252   :  { %v188_v48 = vpop.xlane.xlu1 %187 }
 0x253   :  { %v189_v49 = vsub.f32 %v184_v46, %v188_v48 }
 0x255   :  { %v190_v50 = vmul.f32 1.442695, %v189_v49 }
 0x257   :  { %358 = vpow2.f32 %v190_v50 }
 0x261   :  { %v359_v51 = vpop.eup %358 }
 0x262   :  { %v192_v52 = vsel %vm185_vm2, %v359_v51, 0.0 }
 0x263   :  { %193 = vadd.xlane.f32.xlu1 %v192_v52 }
 0x2f0   :  { %v194_v53 = vpop.xlane.xlu1 %193 }
 0x2f1   :  { %360 = vrcp.f32 %v194_v53 }
 0x2fb   :  { %v361_v56 = vpop.eup %360 }
 0x2fc   :  { %v196_v57 = vmul.f32 %v361_v56, %v359_v51 }
 0x2fe   :  { %v207_v58 = vrot.slane %v196_v57, %v206_v54  ;;  %230 = vst.msk [vmem:[#allocation8] sm:$0x3] %vm185_vm2, %v196_v57  ;;  %v200_v59 = vrot.slane %v196_v57, %v199_v55 }
 0x300   :  { %209 = vbcast.lane.b32.xlu1 %v207_v58, 256  ;;  %202 = vbcast.lane.b32.xlu0 %v200_v59, 256 }
 0x301   :  { %417 = shalt.err (!%p414_p6)
}
 0x302   :  { %s418_s29 = scalar_lea.hbm %s575_s6, 32 }
 0x303   :  { %p419_p7 = scmp.ne.s32.totalorder %s575_s6, %s418_s29  ;;  %p422_p8 = scmp.lt.u32.totalorder %s418_s29, %s575_s6 }
 0x305   :  { %p424_p9 = pnand %p422_p8, %p419_p7 }
 0x307   :  { %427 = shalt.err (!%p424_p9)
}
 0x308   :  { %250 = dma.vmem_to_hbm [thread:$0]  %s248_s4, 32, %s575_s6, [#allocation9]  }
 0x309   :  { %s463_s12 = smov [#allocation7]  }
 0x30a   :  { %s237_s13 = sshll.u32 %s463_s12, 4  ;;  %s238_s13 = int_to_ptr.vmem [resolvable:$true] %s237_s13 }
 0x30b   :  { %s428_s6 = scalar_lea.vmem %s238_s13, 32  ;;  %p433_p11 = scmp.lt.s32.totalorder %s238_s13, %s238_s13 }
 0x30c   :  { %p429_p10 = scmp.ne.s32.totalorder %s238_s13, %s428_s6  ;;  %p434_p12 = scmp.lt.s32.totalorder %s428_s6, %s428_s6 }
 0x30e   :  { %p435_p13 = por %p434_p12, %p433_p11 }
 0x310   :  { %p436_p0 = pnand %p435_p13, %p429_p10 }
 0x372   :  { %v210_v60 = vpop.permute.xlu1 %209  ;;  %v203_v61 = vpop.permute.xlu0 %202 }
 0x373   :  { %v212_v62 = vmul.f32 %v210_v60, %v526_v25  ;;  %v211_v63 = vmul.f32 %v203_v61, %v523_v9 }
 0x375   :  { %v219_v0 = vrot.slane %v212_v62, 4  ;;  %v213_v1 = vrot.slane %v211_v63, 4 }
 0x377   :  { %v220_v2 = vadd.f32 %v219_v0, %v212_v62  ;;  %v214_v3 = vadd.f32 %v213_v1, %v211_v63 }
 0x379   :  { %v221_v4 = vrot.slane %v220_v2, 2  ;;  %v215_v5 = vrot.slane %v214_v3, 2 }
 0x37b   :  { %v222_v6 = vadd.f32 %v221_v4, %v220_v2  ;;  %v216_v7 = vadd.f32 %v215_v5, %v214_v3 }
 0x37d   :  { %v223_v8 = vrot.slane %v222_v6, 1  ;;  %v217_v10 = vrot.slane %v216_v7, 1 }
 0x37f   :  { %v224_v11 = vadd.f32 %v223_v8, %v222_v6  ;;  %v218_v12 = vadd.f32 %v217_v10, %v216_v7 }
 0x381   :  { %v227_v13 = vsel %vm181_vm0, %v224_v11, %v218_v12 }
 0x382   :  { %229 = vst [vmem:[#allocation7] sm:$0x3] %v227_v13 }
 0x383   :  { %439 = shalt.err (!%p436_p0)
}
 0x384   :  { %s440_s16 = scalar_lea.hbm %s574_s5, 32 }
 0x385   :  { %p441_p1 = scmp.ne.s32.totalorder %s574_s5, %s440_s16  ;;  %p444_p2 = scmp.lt.u32.totalorder %s440_s16, %s574_s5 }
 0x387   :  { %p446_p3 = pnand %p444_p2, %p441_p1 }
 0x389   :  { %449 = shalt.err (!%p446_p3)
}
 0x38a   :  { %240 = dma.vmem_to_hbm [thread:$0]  %s238_s13, 32, %s574_s5, [#allocation4]  }
 0x38b   :  { %454 = dma.done.wait [#allocation4], 32  }
 0x38c   :  { %455 = vsyncadd [#allocation4], 4294967264 }
 0x38d   :  { %456 = dma.done.wait [#allocation9], 32  }
 0x38e   :  { %457 = vsyncadd [#allocation9], 4294967264 }
 0x38f   :  { %257 = vsyncpa [#allocation3], 1 }
 0x390   :  { %258 = vsyncpa [#allocation6], 1 }
 0x391   :  { %259 = vsyncpa [#allocation4], 1 }
 0x392   :  { %260 = vsyncpa [#allocation9], 1 }

</bundles_post_ra>
